<compile_context>
chip_gen: v5e
topology: v5e:2x2
jax: 0.10.0
libtpu: 0.0.40
codegen_flags: <defaults>
</compile_context>

<pallas_src>
import math
import functools

import jax
import jax.numpy as jnp
from jax.experimental import pallas as pl


# ----------------------------------------------------------------------------
# Single fused kernel: 2 block-structured entity-MLP matmuls -> merged V|Q|K
# projection -> row-0 attention.
# ----------------------------------------------------------------------------
def _fused_forward_kernel(x_ref, w1_ref, b1_ref, w2_ref, b2_ref, wvqk_ref, bvqk_ref,
                          packed_ref, value_ref, *, B, S, S_pad, H, dk):
    # ---- entity MLPs as two block-structured matmuls (mathematically exact:
    # block-diag W1 + per-row biases keep non-owned hidden blocks at exactly 0)
    x = x_ref[...]                                                   # (B*S_pad, F)
    h = jnp.dot(x, w1_ref[...], preferred_element_type=jnp.float32) + b1_ref[...]
    h = jnp.maximum(h, 0.0)                                          # (B*S_pad, 5H)
    obs = jnp.dot(h, w2_ref[...], preferred_element_type=jnp.float32) + b2_ref[...]
    obs = jnp.maximum(obs, 0.0)                                      # (B*S_pad, H) == obs_embed rows

    # ---- merged [V | Q | K] projection: single MXU weight load over the slab
    vqk = jnp.dot(obs, wvqk_ref[...], preferred_element_type=jnp.float32) + bvqk_ref[...]
    # lanes [0:H) = value, [H:H+dk) = query, [H+dk:H+2dk) = key

    scale = 1.0 / math.sqrt(dk)
    row_ids = jax.lax.broadcasted_iota(jnp.int32, (S_pad, 1), 0)
    valid = row_ids < S                                              # mask padded rows
    # one-hot matrix used to move sublane-oriented (S_pad,1) weights into a
    # lane-dense (1,S_pad) row without an explicit transpose op
    onehot = (jax.lax.broadcasted_iota(jnp.int32, (S_pad, S_pad), 0) ==
              jax.lax.broadcasted_iota(jnp.int32, (S_pad, S_pad), 1)).astype(jnp.float32)

    for b in range(B):                                               # B=2: static, unrolled
        base = b * S_pad                                             # sublane-tile aligned
        v_b = vqk[base:base + S_pad, :H]                             # (S_pad, H)   value rows
        q0 = vqk[base:base + 1, H:H + dk] * scale                    # (1, dk)      row-0 query
        k_b = vqk[base:base + S_pad, H + dk:H + 2 * dk]              # (S_pad, dk)  keys

        # row-0 scores: VPU multiply + lane reduction (no MXU weight load)
        s_b = jnp.sum(q0 * k_b, axis=-1, keepdims=True)              # (S_pad, 1)
        s_b = jnp.where(valid, s_b, -1e30)                           # kill padded positions
        s_b = s_b - jnp.max(s_b, axis=0, keepdims=True)
        e_b = jnp.exp(s_b)
        denom = jnp.sum(e_b, axis=0, keepdims=True)
        w_b = e_b / denom                                            # exact normalisation
        w_b = jnp.where(valid, w_b, 0.0)

        wgf_b = jnp.sum(w_b * v_b, axis=0, keepdims=True)            # (1, H)
        w_row = jnp.sum(w_b * onehot, axis=0, keepdims=True)         # (1, S_pad) lane-dense

        value_ref[b, :, :] = v_b[:S, :]
        packed_ref[b:b + 1, :S] = w_row[:, :S]
        packed_ref[b:b + 1, S:] = wgf_b


# ----------------------------------------------------------------------------
# One-time parameter packing (hoisted out of the forward).
# ----------------------------------------------------------------------------
def pack_params(params, input_dim, hidden_dim, batch, n_wolf, n_sheep, n_landmark):
    H, D = hidden_dim, input_dim
    names = ("action", "wolf", "sheep", "landmark", "wall")
    fans = (5, D, D, D, D)
    counts = (1, n_wolf, n_sheep, n_landmark, 1)          # rows per entity type, S order
    F = sum(fans)
    S = sum(counts)
    S_pad = ((S + 7) // 8) * 8

    w1s = jnp.zeros((F, 5 * H), jnp.float32)              # block-diagonal layer-1 weight
    w2s = jnp.zeros((5 * H, H), jnp.float32)              # row-stacked layer-2 weight
    b1_type = jnp.zeros((5, 5 * H), jnp.float32)          # per-type layer-1 bias (own block only)
    b2_type = jnp.zeros((5, H), jnp.float32)
    r = 0
    for t, (name, fan) in enumerate(zip(names, fans)):
        w1, b1 = params[f"{name}_fc1"]
        w2, b2 = params[f"{name}_fc2"]
        w1s = w1s.at[r:r + fan, t * H:(t + 1) * H].set(w1)
        w2s = w2s.at[t * H:(t + 1) * H, :].set(w2)
        b1_type = b1_type.at[t, t * H:(t + 1) * H].set(b1)
        b2_type = b2_type.at[t, :].set(b2)
        r += fan

    type_of_row = jnp.array(sum(([t] * c for t, c in enumerate(counts)), []), jnp.int32)
    pad_rows = S_pad - S
    b1_rows = jnp.concatenate([b1_type[type_of_row],
                               jnp.zeros((pad_rows, 5 * H), jnp.float32)], axis=0)
    b2_rows = jnp.concatenate([b2_type[type_of_row],
                               jnp.zeros((pad_rows, H), jnp.float32)], axis=0)

    wq, bq = params["fc_query"]
    wk, bk = params["fc_key"]
    wv, bv = params["fc_value"]

    return dict(
        w1s=w1s,
        b1=jnp.tile(b1_rows, (batch, 1)),                 # per-row bias (zero on padded rows)
        w2s=w2s,
        b2=jnp.tile(b2_rows, (batch, 1)),
        wvqk=jnp.concatenate([wv, wq, wk], axis=1),       # [V | Q | K]: value lane-aligned at 0
        bvqk=jnp.concatenate([bv, bq, bk], axis=0).reshape(1, -1),
    )


# ----------------------------------------------------------------------------
# Forward wrapper: build the block-structured input slab, single pallas_call.
# ----------------------------------------------------------------------------
def inverse_net_forward(packed, action, wolf_gf, sheep_gf, landmark_gf, wall_gf):
    B = action.shape[0]
    D = wolf_gf.shape[-1]
    Nw, Ns, Nl = wolf_gf.shape[1], sheep_gf.shape[1], landmark_gf.shape[1]
    S = 1 + Nw + Ns + Nl + 1
    S_pad = ((S + 7) // 8) * 8
    F = packed["w1s"].shape[0]
    H = packed["w2s"].shape[1]
    dk = (packed["wvqk"].shape[1] - H) // 2
    assert packed["b1"].shape[0] == B * S_pad, "packed params were built for a different B/S"

    # Block-structured input slab: row (b, s) carries that entity's input in
    # its own fan-in block, zeros elsewhere; padded rows are all-zero.
    off = (0, 5, 5 + D, 5 + 2 * D, 5 + 3 * D)
    parts = [
        jnp.pad(action[:, None, :], ((0, 0), (0, 0), (0, F - 5))),
        jnp.pad(wolf_gf, ((0, 0), (0, 0), (off[1], F - off[1] - D))),
        jnp.pad(sheep_gf, ((0, 0), (0, 0), (off[2], F - off[2] - D))),
        jnp.pad(landmark_gf, ((0, 0), (0, 0), (off[3], F - off[3] - D))),
        jnp.pad(wall_gf[:, None, :], ((0, 0), (0, 0), (off[4], 0))),
    ]
    x = jnp.concatenate(parts, axis=1)                               # (B, S, F)
    x = jnp.pad(x, ((0, 0), (0, S_pad - S), (0, 0))).reshape(B * S_pad, F)

    M = B * S_pad
    cost = pl.CostEstimate(
        flops=2 * M * (F * 5 * H + 5 * H * H + H * (H + 2 * dk)),
        transcendentals=M,
        bytes_accessed=4 * (M * F + F * 5 * H + M * 5 * H + 5 * H * H + M * H
                            + H * (H + 2 * dk) + (H + 2 * dk)
                            + B * (S + H) + B * S * H),
    )

    kern = functools.partial(_fused_forward_kernel, B=B, S=S, S_pad=S_pad, H=H, dk=dk)
    packed_out, value = pl.pallas_call(
        kern,
        out_shape=[
            jax.ShapeDtypeStruct((B, S + H), jnp.float32),           # [weight | weighted_gf]
            jax.ShapeDtypeStruct((B, S, H), jnp.float32),            # value
        ],
        cost_estimate=cost,
    )(x, packed["w1s"], packed["b1"], packed["w2s"], packed["b2"],
      packed["wvqk"], packed["bvqk"])

    weight = packed_out[:, :S]
    weighted_gf = packed_out[:, S:]
    return weight, weighted_gf, value


# ----------------------------------------------------------------------------
# Parameter init (deterministic, torch.nn.Linear-style uniform bounds).
# Weights stored as (fan_in, fan_out) so the math is x @ W + b.
# ----------------------------------------------------------------------------
def init_params(key, input_dim, hidden_dim, dk):
    def linear(k, fan_in, fan_out):
        kw, kb = jax.random.split(k)
        bound = 1.0 / math.sqrt(fan_in)
        w = jax.random.uniform(kw, (fan_in, fan_out), jnp.float32, -bound, bound)
        b = jax.random.uniform(kb, (fan_out,), jnp.float32, -bound, bound)
        return w, b

    names_fans = [
        ("action_fc1", 5, hidden_dim), ("action_fc2", hidden_dim, hidden_dim),
        ("wolf_fc1", input_dim, hidden_dim), ("wolf_fc2", hidden_dim, hidden_dim),
        ("sheep_fc1", input_dim, hidden_dim), ("sheep_fc2", hidden_dim, hidden_dim),
        ("wall_fc1", input_dim, hidden_dim), ("wall_fc2", hidden_dim, hidden_dim),
        ("landmark_fc1", input_dim, hidden_dim), ("landmark_fc2", hidden_dim, hidden_dim),
        ("fc_query", hidden_dim, dk), ("fc_key", hidden_dim, dk),
        ("fc_value", hidden_dim, hidden_dim),
    ]
    keys = jax.random.split(key, len(names_fans))
    return {name: linear(k, fi, fo) for k, (name, fi, fo) in zip(keys, names_fans)}


# ----------------------------------------------------------------------------
# Pure-JAX reference (uses the original unpacked params) for correctness.
# ----------------------------------------------------------------------------
def _ref_forward(params, action, wolf_gf, sheep_gf, landmark_gf, wall_gf, dk):
    def lin(x, p):
        return x @ p[0] + p[1]

    def embed(x, a, b):
        return jax.nn.relu(lin(jax.nn.relu(lin(x, params[a])), params[b]))

    obs = jnp.concatenate(
        [embed(action, "action_fc1", "action_fc2")[:, None, :],
         embed(wolf_gf, "wolf_fc1", "wolf_fc2"),
         embed(sheep_gf, "sheep_fc1", "sheep_fc2"),
         embed(landmark_gf, "landmark_fc1", "landmark_fc2"),
         embed(wall_gf, "wall_fc1", "wall_fc2")[:, None, :]], axis=1)
    q = lin(obs, params["fc_query"])
    k = lin(obs, params["fc_key"])
    v = lin(obs, params["fc_value"])
    w = jax.nn.softmax(jnp.einsum("bsd,btd->bst", q, k) / math.sqrt(dk), axis=2)
    wg = jnp.einsum("bst,bth->bsh", w, v)
    return w[:, 0, :], wg[:, 0, :], v


if __name__ == "__main__":
    input_dim, hidden_dim, dk = 10, 32, 16
    B, Nw, Ns, Nl = 2, 3, 2, 3

    key = jax.random.PRNGKey(0)
    kp, ka, kw, ks, kl, kwl = jax.random.split(key, 6)
    params = init_params(kp, input_dim, hidden_dim, dk)
    packed = pack_params(params, input_dim, hidden_dim, B, Nw, Ns, Nl)   # once, not per-call

    action = jax.random.normal(ka, (B, 5), jnp.float32)
    wolf_gf = jax.random.normal(kw, (B, Nw, input_dim), jnp.float32)
    sheep_gf = jax.random.normal(ks, (B, Ns, input_dim), jnp.float32)
    landmark_gf = jax.random.normal(kl, (B, Nl, input_dim), jnp.float32)
    wall_gf = jax.random.normal(kwl, (B, input_dim), jnp.float32)

    fwd = jax.jit(inverse_net_forward)
    weight, weighted_gf, value = jax.block_until_ready(
        fwd(packed, action, wolf_gf, sheep_gf, landmark_gf, wall_gf))

    rw, rwg, rv = _ref_forward(params, action, wolf_gf, sheep_gf, landmark_gf, wall_gf, dk)
    S = 1 + Nw + Ns + Nl + 1
    assert weight.shape == (B, S)
    assert weighted_gf.shape == (B, hidden_dim)
    assert value.shape == (B, S, hidden_dim)
    assert jnp.allclose(weight, rw, rtol=2e-3, atol=2e-3)
    assert jnp.allclose(weighted_gf, rwg, rtol=2e-3, atol=2e-3)
    assert jnp.allclose(value, rv, rtol=2e-3, atol=2e-3)

    print("KERNEL_OK")
</pallas_src>

<mosaic_0001>
module attributes {stable_mosaic.version = 11 : i64} {
  func.func @_fused_forward_kernel(%arg0: memref<32x45xf32, #tpu.memory_space<vmem>>, %arg1: memref<45x160xf32, #tpu.memory_space<vmem>>, %arg2: memref<32x160xf32, #tpu.memory_space<vmem>>, %arg3: memref<160x32xf32, #tpu.memory_space<vmem>>, %arg4: memref<32x32xf32, #tpu.memory_space<vmem>>, %arg5: memref<32x64xf32, #tpu.memory_space<vmem>>, %arg6: memref<1x64xf32, #tpu.memory_space<vmem>>, %arg7: memref<2x42xf32, #tpu.memory_space<vmem>>, %arg8: memref<2x10x32xf32, #tpu.memory_space<vmem>>) attributes {dimension_semantics = [], scalar_prefetch = 0 : i64, scratch_operands = 0 : i64, tpu.core_type = #tpu.core_type<tc>} {
    %c0 = arith.constant 0 : index
    %c0_0 = arith.constant 0 : index
    %0 = vector.load %arg0[%c0, %c0_0] : memref<32x45xf32, #tpu.memory_space<vmem>>, vector<32x45xf32>
    %c0_1 = arith.constant 0 : index
    %c0_2 = arith.constant 0 : index
    %1 = vector.load %arg1[%c0_1, %c0_2] : memref<45x160xf32, #tpu.memory_space<vmem>>, vector<45x160xf32>
    %cst = arith.constant dense<0.000000e+00> : vector<32x160xf32>
    %2 = tpu.matmul %0, %1, %cst {dimension_numbers = #tpu.dot_dimension_numbers<[1], [0], [0], [1], [0, 0, 1, 1], [], []>} : vector<32x45xf32>, vector<45x160xf32>, vector<32x160xf32> -> vector<32x160xf32>
    %c0_3 = arith.constant 0 : index
    %c0_4 = arith.constant 0 : index
    %3 = vector.load %arg2[%c0_3, %c0_4] : memref<32x160xf32, #tpu.memory_space<vmem>>, vector<32x160xf32>
    %4 = arith.addf %2, %3 : vector<32x160xf32>
    %cst_5 = arith.constant 0.000000e+00 : f32
    %5 = vector.broadcast %cst_5 : f32 to vector<32x160xf32>
    %6 = arith.maximumf %4, %5 : vector<32x160xf32>
    %c0_6 = arith.constant 0 : index
    %c0_7 = arith.constant 0 : index
    %7 = vector.load %arg3[%c0_6, %c0_7] : memref<160x32xf32, #tpu.memory_space<vmem>>, vector<160x32xf32>
    %cst_8 = arith.constant dense<0.000000e+00> : vector<32x32xf32>
    %8 = tpu.matmul %6, %7, %cst_8 {dimension_numbers = #tpu.dot_dimension_numbers<[1], [0], [0], [1], [0, 0, 1, 1], [], []>} : vector<32x160xf32>, vector<160x32xf32>, vector<32x32xf32> -> vector<32x32xf32>
    %c0_9 = arith.constant 0 : index
    %c0_10 = arith.constant 0 : index
    %9 = vector.load %arg4[%c0_9, %c0_10] : memref<32x32xf32, #tpu.memory_space<vmem>>, vector<32x32xf32>
    %10 = arith.addf %8, %9 : vector<32x32xf32>
    %cst_11 = arith.constant 0.000000e+00 : f32
    %11 = vector.broadcast %cst_11 : f32 to vector<32x32xf32>
    %12 = arith.maximumf %10, %11 : vector<32x32xf32>
    %c0_12 = arith.constant 0 : index
    %c0_13 = arith.constant 0 : index
    %13 = vector.load %arg5[%c0_12, %c0_13] : memref<32x64xf32, #tpu.memory_space<vmem>>, vector<32x64xf32>
    %cst_14 = arith.constant dense<0.000000e+00> : vector<32x64xf32>
    %14 = tpu.matmul %12, %13, %cst_14 {dimension_numbers = #tpu.dot_dimension_numbers<[1], [0], [0], [1], [0, 0, 1, 1], [], []>} : vector<32x32xf32>, vector<32x64xf32>, vector<32x64xf32> -> vector<32x64xf32>
    %c0_15 = arith.constant 0 : index
    %c0_16 = arith.constant 0 : index
    %15 = vector.load %arg6[%c0_15, %c0_16] : memref<1x64xf32, #tpu.memory_space<vmem>>, vector<1x64xf32>
    %16 = vector.broadcast %15 : vector<1x64xf32> to vector<32x64xf32>
    %17 = arith.addf %14, %16 : vector<32x64xf32>
    %18 = tpu.iota {dimensions = array<i32: 0>} : vector<16x1xi32>
    %c10_i32 = arith.constant 10 : i32
    %19 = vector.broadcast %c10_i32 : i32 to vector<16x1xi32>
    %20 = arith.cmpi slt, %18, %19 : vector<16x1xi32>
    %21 = tpu.iota {dimensions = array<i32: 0>} : vector<16x16xi32>
    %22 = tpu.iota {dimensions = array<i32: 1>} : vector<16x16xi32>
    %23 = arith.cmpi eq, %21, %22 : vector<16x16xi32>
    %24 = arith.extui %23 : vector<16x16xi1> to vector<16x16xi32>
    %25 = arith.sitofp %24 : vector<16x16xi32> to vector<16x16xf32>
    %26 = vector.extract_strided_slice %17 {offsets = [0, 0], sizes = [16, 32], strides = [1, 1]} : vector<32x64xf32> to vector<16x32xf32>
    %27 = vector.extract_strided_slice %17 {offsets = [0, 32], sizes = [1, 16], strides = [1, 1]} : vector<32x64xf32> to vector<1x16xf32>
    %cst_17 = arith.constant 2.500000e-01 : f32
    %28 = vector.broadcast %cst_17 : f32 to vector<1x16xf32>
    %29 = arith.mulf %27, %28 : vector<1x16xf32>
    %30 = vector.extract_strided_slice %17 {offsets = [0, 48], sizes = [16, 16], strides = [1, 1]} : vector<32x64xf32> to vector<16x16xf32>
    %31 = vector.broadcast %29 : vector<1x16xf32> to vector<16x16xf32>
    %32 = arith.mulf %31, %30 : vector<16x16xf32>
    %cst_18 = arith.constant dense<0.000000e+00> : vector<16xf32>
    %33 = vector.multi_reduction <add>, %32, %cst_18 [1] : vector<16x16xf32> to vector<16xf32>
    %34 = vector.shape_cast %33 : vector<16xf32> to vector<16x1xf32>
    %cst_19 = arith.constant -1.000000e+30 : f32
    %35 = vector.broadcast %cst_19 : f32 to vector<16x1xf32>
    %36 = arith.select %20, %34, %35 : vector<16x1xi1>, vector<16x1xf32>
    %cst_20 = arith.constant dense<0xFF800000> : vector<1xf32>
    %37 = vector.multi_reduction <maximumf>, %36, %cst_20 [0] : vector<16x1xf32> to vector<1xf32>
    %38 = vector.shape_cast %37 : vector<1xf32> to vector<1x1xf32>
    %39 = vector.broadcast %38 : vector<1x1xf32> to vector<16x1xf32>
    %40 = arith.subf %36, %39 : vector<16x1xf32>
    %41 = math.exp %40 : vector<16x1xf32>
    %cst_21 = arith.constant dense<0.000000e+00> : vector<1xf32>
    %42 = vector.multi_reduction <add>, %41, %cst_21 [0] : vector<16x1xf32> to vector<1xf32>
    %43 = vector.shape_cast %42 : vector<1xf32> to vector<1x1xf32>
    %44 = vector.broadcast %43 : vector<1x1xf32> to vector<16x1xf32>
    %45 = arith.divf %41, %44 : vector<16x1xf32>
    %cst_22 = arith.constant 0.000000e+00 : f32
    %46 = vector.broadcast %cst_22 : f32 to vector<16x1xf32>
    %47 = arith.select %20, %45, %46 : vector<16x1xi1>, vector<16x1xf32>
    %48 = vector.broadcast %47 : vector<16x1xf32> to vector<16x32xf32>
    %49 = arith.mulf %48, %26 : vector<16x32xf32>
    %cst_23 = arith.constant dense<0.000000e+00> : vector<32xf32>
    %50 = vector.multi_reduction <add>, %49, %cst_23 [0] : vector<16x32xf32> to vector<32xf32>
    %51 = vector.shape_cast %50 : vector<32xf32> to vector<1x32xf32>
    %52 = vector.broadcast %47 : vector<16x1xf32> to vector<16x16xf32>
    %53 = arith.mulf %52, %25 : vector<16x16xf32>
    %cst_24 = arith.constant dense<0.000000e+00> : vector<16xf32>
    %54 = vector.multi_reduction <add>, %53, %cst_24 [0] : vector<16x16xf32> to vector<16xf32>
    %55 = vector.shape_cast %54 : vector<16xf32> to vector<1x16xf32>
    %56 = vector.extract_strided_slice %26 {offsets = [0, 0], sizes = [10, 32], strides = [1, 1]} : vector<16x32xf32> to vector<10x32xf32>
    %c0_25 = arith.constant 0 : index
    %c0_26 = arith.constant 0 : index
    %c0_27 = arith.constant 0 : index
    %57 = vector.load %arg8[%c0_25, %c0_26, %c0_27] : memref<2x10x32xf32, #tpu.memory_space<vmem>>, vector<1x10x32xf32>
    %58 = vector.shape_cast %57 : vector<1x10x32xf32> to vector<10x32xf32>
    %59 = vector.shape_cast %56 : vector<10x32xf32> to vector<1x10x32xf32>
    tpu.vector_store %arg8[%c0_25, %c0_26, %c0_27], %59 {strides = array<i32>} : memref<2x10x32xf32, #tpu.memory_space<vmem>>, vector<1x10x32xf32>,
    %60 = vector.extract_strided_slice %55 {offsets = [0, 0], sizes = [1, 10], strides = [1, 1]} : vector<1x16xf32> to vector<1x10xf32>
    %c0_28 = arith.constant 0 : index
    %c0_29 = arith.constant 0 : index
    %61 = vector.load %arg7[%c0_28, %c0_29] : memref<2x42xf32, #tpu.memory_space<vmem>>, vector<1x10xf32>
    tpu.vector_store %arg7[%c0_28, %c0_29], %60 {strides = array<i32>} : memref<2x42xf32, #tpu.memory_space<vmem>>, vector<1x10xf32>,
    %c0_30 = arith.constant 0 : index
    %c10 = arith.constant 10 : index
    %62 = vector.load %arg7[%c0_30, %c10] : memref<2x42xf32, #tpu.memory_space<vmem>>, vector<1x32xf32>
    tpu.vector_store %arg7[%c0_30, %c10], %51 {strides = array<i32>} : memref<2x42xf32, #tpu.memory_space<vmem>>, vector<1x32xf32>,
    %63 = vector.extract_strided_slice %17 {offsets = [16, 0], sizes = [16, 32], strides = [1, 1]} : vector<32x64xf32> to vector<16x32xf32>
    %64 = vector.extract_strided_slice %17 {offsets = [16, 32], sizes = [1, 16], strides = [1, 1]} : vector<32x64xf32> to vector<1x16xf32>
    %cst_31 = arith.constant 2.500000e-01 : f32
    %65 = vector.broadcast %cst_31 : f32 to vector<1x16xf32>
    %66 = arith.mulf %64, %65 : vector<1x16xf32>
    %67 = vector.extract_strided_slice %17 {offsets = [16, 48], sizes = [16, 16], strides = [1, 1]} : vector<32x64xf32> to vector<16x16xf32>
    %68 = vector.broadcast %66 : vector<1x16xf32> to vector<16x16xf32>
    %69 = arith.mulf %68, %67 : vector<16x16xf32>
    %cst_32 = arith.constant dense<0.000000e+00> : vector<16xf32>
    %70 = vector.multi_reduction <add>, %69, %cst_32 [1] : vector<16x16xf32> to vector<16xf32>
    %71 = vector.shape_cast %70 : vector<16xf32> to vector<16x1xf32>
    %cst_33 = arith.constant -1.000000e+30 : f32
    %72 = vector.broadcast %cst_33 : f32 to vector<16x1xf32>
    %73 = arith.select %20, %71, %72 : vector<16x1xi1>, vector<16x1xf32>
    %cst_34 = arith.constant dense<0xFF800000> : vector<1xf32>
    %74 = vector.multi_reduction <maximumf>, %73, %cst_34 [0] : vector<16x1xf32> to vector<1xf32>
    %75 = vector.shape_cast %74 : vector<1xf32> to vector<1x1xf32>
    %76 = vector.broadcast %75 : vector<1x1xf32> to vector<16x1xf32>
    %77 = arith.subf %73, %76 : vector<16x1xf32>
    %78 = math.exp %77 : vector<16x1xf32>
    %cst_35 = arith.constant dense<0.000000e+00> : vector<1xf32>
    %79 = vector.multi_reduction <add>, %78, %cst_35 [0] : vector<16x1xf32> to vector<1xf32>
    %80 = vector.shape_cast %79 : vector<1xf32> to vector<1x1xf32>
    %81 = vector.broadcast %80 : vector<1x1xf32> to vector<16x1xf32>
    %82 = arith.divf %78, %81 : vector<16x1xf32>
    %cst_36 = arith.constant 0.000000e+00 : f32
    %83 = vector.broadcast %cst_36 : f32 to vector<16x1xf32>
    %84 = arith.select %20, %82, %83 : vector<16x1xi1>, vector<16x1xf32>
    %85 = vector.broadcast %84 : vector<16x1xf32> to vector<16x32xf32>
    %86 = arith.mulf %85, %63 : vector<16x32xf32>
    %cst_37 = arith.constant dense<0.000000e+00> : vector<32xf32>
    %87 = vector.multi_reduction <add>, %86, %cst_37 [0] : vector<16x32xf32> to vector<32xf32>
    %88 = vector.shape_cast %87 : vector<32xf32> to vector<1x32xf32>
    %89 = vector.broadcast %84 : vector<16x1xf32> to vector<16x16xf32>
    %90 = arith.mulf %89, %25 : vector<16x16xf32>
    %cst_38 = arith.constant dense<0.000000e+00> : vector<16xf32>
    %91 = vector.multi_reduction <add>, %90, %cst_38 [0] : vector<16x16xf32> to vector<16xf32>
    %92 = vector.shape_cast %91 : vector<16xf32> to vector<1x16xf32>
    %93 = vector.extract_strided_slice %63 {offsets = [0, 0], sizes = [10, 32], strides = [1, 1]} : vector<16x32xf32> to vector<10x32xf32>
    %c1 = arith.constant 1 : index
    %c0_39 = arith.constant 0 : index
    %c0_40 = arith.constant 0 : index
    %94 = vector.load %arg8[%c1, %c0_39, %c0_40] : memref<2x10x32xf32, #tpu.memory_space<vmem>>, vector<1x10x32xf32>
    %95 = vector.shape_cast %94 : vector<1x10x32xf32> to vector<10x32xf32>
    %96 = vector.shape_cast %93 : vector<10x32xf32> to vector<1x10x32xf32>
    tpu.vector_store %arg8[%c1, %c0_39, %c0_40], %96 {strides = array<i32>} : memref<2x10x32xf32, #tpu.memory_space<vmem>>, vector<1x10x32xf32>,
    %97 = vector.extract_strided_slice %92 {offsets = [0, 0], sizes = [1, 10], strides = [1, 1]} : vector<1x16xf32> to vector<1x10xf32>
    %c1_41 = arith.constant 1 : index
    %c0_42 = arith.constant 0 : index
    %98 = vector.load %arg7[%c1_41, %c0_42] : memref<2x42xf32, #tpu.memory_space<vmem>>, vector<1x10xf32>
    tpu.vector_store %arg7[%c1_41, %c0_42], %97 {strides = array<i32>} : memref<2x42xf32, #tpu.memory_space<vmem>>, vector<1x10xf32>,
    %c1_43 = arith.constant 1 : index
    %c10_44 = arith.constant 10 : index
    %99 = vector.load %arg7[%c1_43, %c10_44] : memref<2x42xf32, #tpu.memory_space<vmem>>, vector<1x32xf32>
    tpu.vector_store %arg7[%c1_43, %c10_44], %88 {strides = array<i32>} : memref<2x42xf32, #tpu.memory_space<vmem>>, vector<1x32xf32>,
    return
  }
}

</mosaic_0001>

<bundles_post_ra>
// kernel: inverse_net_forward.1
= control target key start
LH: loop header
LB: loop body
LE: loop exit
PB: predicated region body
PF: predicated region fallthrough
CT: control target
= control target key end

     0   :  { %vm65_vm0 = vcmask 1044480   ;;  %vm52_vm1 = vcmask 367616   ;;  %vm162_vm2 = vcmask 261120   ;;  %s563_s15 = smov 112   ;;  %vm389_vm3 = vcmask 254976   ;;  %s564_s20 = smov 96   ;;  %s873_s1 = inlined_call_operand.vmem [shape: f32[45,160], index: 1, kind: input, shape index: {}]   ;;  %s874_s3 = inlined_call_operand.vmem [shape: f32[160,32], index: 3, kind: input, shape index: {}]   ;;  %s875_s0 = inlined_call_operand.vmem [shape: f32[32,45], index: 0, kind: input, shape index: {}]   ;;  %s876_s5 = inlined_call_operand.vmem [shape: f32[32,64], index: 5, kind: input, shape index: {}]   ;;  %s877_s2 = inlined_call_operand.vmem [shape: f32[32,160], index: 2, kind: input, shape index: {}]   ;;  %s878_s6 = inlined_call_operand.vmem [shape: f32[1,64], index: 6, kind: input, shape index: {}]   ;;  %s879_s4 = inlined_call_operand.vmem [shape: f32[32,32], index: 4, kind: input, shape index: {}]   ;;  %s880_s8 = inlined_call_operand.vmem [shape: f32[2,10,32], index: 8, kind: output, shape index: {1}]   ;;  %s881_s7 = inlined_call_operand.vmem [shape: f32[2,42], index: 7, kind: output, shape index: {0}]  }
   0x1   :  { %v42_v0 = vld [vmem:[%s873_s1 + $0x50] sm:$0x1f]  ;;  %v40_v1 = vld [vmem:[%s873_s1 + $0x40] sm:$0xff]  ;;  %v43_v2 = vld [vmem:[%s873_s1 + $0x58] sm:$0x1f]  ;;  %vm319_vm4 = vcmask 130048  }
   0x2   :  { %504 = vmatpush.msk.msra.mxu0 %vm65_vm0, %v42_v0  ;;  %509 = vmatpush.msk.msra.mxu1 %vm65_vm0, %v43_v2  ;;  %v41_v3 = vld [vmem:[%s873_s1 + $0x48] sm:$0xff]  ;;  %v38_v4 = vld [vmem:[%s873_s1 + $0x30] sm:$0xff]  ;;  %v39_v5 = vld [vmem:[%s873_s1 + $0x38] sm:$0xff]  ;;  %vm391_vm12 = vcmask 73728   ;;  %s566_s22 = smov 10  }
   0x3   :  { %v36_v6 = vld [vmem:[%s873_s1 + $0x20] sm:$0xff]  ;;  %v37_v7 = vld [vmem:[%s873_s1 + $0x28] sm:$0xff]  ;;  %v153_v8 = vld [vmem:[%s874_s3 + $0x78] sm:$0xff] }
   0x4   :  { %83 = vmatpush.msra.mxu0 %v40_v1  ;;  %112 = vmatpush.msra.mxu1 %v41_v3  ;;  %v34_v9 = vld [vmem:[%s873_s1 + $0x10] sm:$0xff]  ;;  %v35_v10 = vld [vmem:[%s873_s1 + $0x18] sm:$0xff]  ;;  %v32_v13 = vld [vmem:[%s873_s1] sm:$0xff] }
   0x5   :  { %526 = vmatpush.msra.mxu2 %v153_v8  ;;  %v152_v11 = vld [vmem:[%s874_s3 + $0x70] sm:$0xff]  ;;  %v157_v12 = vld [vmem:[%s874_s3 + $0x98] sm:$0xff]  ;;  %v33_v14 = vld [vmem:[%s873_s1 + $0x8] sm:$0xff] }
   0x6   :  { %84 = vmatpush.msra.mxu0 %v38_v4  ;;  %113 = vmatpush.msra.mxu1 %v39_v5  ;;  %v28_v15 = vld [vmem:[%s875_s0] sm:$0xff]  ;;  %v151_v16 = vld [vmem:[%s874_s3 + $0x68] sm:$0xff]  ;;  %v156_v17 = vld [vmem:[%s874_s3 + $0x90] sm:$0xff] }
   0x7   :  { %527 = vmatpush.msra.mxu2 %v152_v11  ;;  %542 = vmatpush.msra.mxu3 %v157_v12  ;;  %v150_v18 = vld [vmem:[%s874_s3 + $0x60] sm:$0xff]  ;;  %v155_v19 = vld [vmem:[%s874_s3 + $0x88] sm:$0xff]  ;;  %v149_v20 = vld [vmem:[%s874_s3 + $0x58] sm:$0xff] }
   0x8   :  { %85 = vmatpush.msra.mxu0 %v36_v6  ;;  %114 = vmatpush.msra.mxu1 %v37_v7  ;;  %v29_v21 = vld [vmem:[%s875_s0 + $0x8] sm:$0xff]  ;;  %v148_v22 = vld [vmem:[%s874_s3 + $0x50] sm:$0xff]  ;;  %v146_v24 = vld [vmem:[%s874_s3 + $0x40] sm:$0xff] }
   0x9   :  { %528 = vmatpush.msra.mxu2 %v151_v16  ;;  %543 = vmatpush.msra.mxu3 %v156_v17  ;;  %v147_v23 = vld [vmem:[%s874_s3 + $0x48] sm:$0xff]  ;;  %v145_v25 = vld [vmem:[%s874_s3 + $0x38] sm:$0xff]  ;;  %v30_v26 = vld [vmem:[%s875_s0 + $0x10] sm:$0xff] }
   0xa   :  { %86 = vmatpush.msra.mxu0 %v34_v9  ;;  %115 = vmatpush.msra.mxu1 %v35_v10  ;;  %v144_v27 = vld [vmem:[%s874_s3 + $0x30] sm:$0xff]  ;;  %v143_v28 = vld [vmem:[%s874_s3 + $0x28] sm:$0xff]  ;;  %v142_v29 = vld [vmem:[%s874_s3 + $0x20] sm:$0xff] }
   0xb   :  { %529 = vmatpush.msra.mxu2 %v150_v18  ;;  %544 = vmatpush.msra.mxu3 %v155_v19  ;;  %v141_v30 = vld [vmem:[%s874_s3 + $0x18] sm:$0xff]  ;;  %v140_v32 = vld [vmem:[%s874_s3 + $0x10] sm:$0xff]  ;;  %v139_v33 = vld [vmem:[%s874_s3 + $0x8] sm:$0xff] }
   0xc   :  { %87 = vmatpush.msra.mxu0 %v32_v13  ;;  %116 = vmatpush.msra.mxu1 %v33_v14  ;;  %v31_v31 = vld [vmem:[%s875_s0 + $0x18] sm:$0xff]  ;;  %v138_v34 = vld [vmem:[%s874_s3] sm:$0xff]  ;;  %v45_v38 = vld [vmem:[%s877_s2 + $0x8] sm:$0xff] }
   0xd   :  { %505 = vmatmul.msk.f32.vlgmr.msra.gmra.mxu0 %vm52_vm1, %v28_v15  ;;  %510 = vmatmul.msk.f32.vlgmr.msra.gmra.mxu1 %vm52_vm1, %v28_v15  ;;  %v154_v35 = vld [vmem:[%s874_s3 + $0x80] sm:$0xff]  ;;  %v240_v36 = vld [vmem:[%s876_s5 + $0x18] sm:$0xff]  ;;  %v46_v45 = vld [vmem:[%s877_s2 + $0x10] sm:$0xff] }
   0xe   :  { %175 = vmatpush.msrb.mxu1 %v153_v8  ;;  %216 = vmatpush.msrb.mxu0 %v157_v12  ;;  %v44_v37 = vld [vmem:[%s877_s2] sm:$0xff]  ;;  %v47_v46 = vld [vmem:[%s877_s2 + $0x18] sm:$0xff]  ;;  %v49_v54 = vld [vmem:[%s877_s2 + $0x28] sm:$0xff] }
   0xf   :  { %530 = vmatpush.msra.mxu2 %v149_v20  ;;  %545 = vmatpush.msra.mxu3 %v154_v35  ;;  %v48_v53 = vld [vmem:[%s877_s2 + $0x20] sm:$0xff]  ;;  %v50_v61 = vld [vmem:[%s877_s2 + $0x30] sm:$0xff]  ;;  %v51_v62 = vld [vmem:[%s877_s2 + $0x38] sm:$0xff] }
  0x10   :  { %176 = vmatpush.msrb.mxu1 %v152_v11  ;;  %217 = vmatpush.msrb.mxu0 %v156_v17  ;;  %v239_v5 = vld [vmem:[%s876_s5 + $0x10] sm:$0xff]  ;;  %v238_v6 = vld [vmem:[%s876_s5 + $0x8] sm:$0xff]  ;;  %v237_v7 = vld [vmem:[%s876_s5] sm:$0xff] }
  0x11   :  { %531 = vmatpush.msra.mxu2 %v148_v22  ;;  %269 = vmatpush.msrb.mxu3 %v240_v36  ;;  %v158_v8 = vld [vmem:[%s879_s4] sm:$0xff]  ;;  %v159_v14 = vld [vmem:[%s879_s4 + $0x8] sm:$0xff] }
  0x12   :  { %177 = vmatpush.msrb.mxu1 %v151_v16  ;;  %218 = vmatpush.msrb.mxu0 %v155_v19 }
  0x13   :  { %532 = vmatpush.msra.mxu2 %v147_v23  ;;  %270 = vmatpush.msrb.mxu3 %v239_v5 }
  0x14   :  { %178 = vmatpush.msrb.mxu1 %v150_v18  ;;  %219 = vmatpush.msrb.mxu0 %v154_v35 }
  0x15   :  { %506 = vmatmul.msk.f32.gmra.mxu0 %vm52_vm1, %v29_v21  ;;  %511 = vmatmul.msk.f32.gmra.mxu1 %vm52_vm1, %v29_v21 }
  0x16   :  { %179 = vmatpush.msrb.mxu1 %v149_v20  ;;  %533 = vmatpush.msra.mxu2 %v146_v24  ;;  %v160_v20 = vld [vmem:[%s879_s4 + $0x10] sm:$0xff] }
  0x17   :  { %271 = vmatpush.msrb.mxu3 %v238_v6 }
  0x18   :  { %180 = vmatpush.msrb.mxu1 %v148_v22  ;;  %534 = vmatpush.msra.mxu2 %v145_v25 }
  0x19   :  { %272 = vmatpush.msrb.mxu3 %v237_v7 }
  0x1a   :  { %181 = vmatpush.msrb.mxu1 %v147_v23  ;;  %535 = vmatpush.msra.mxu2 %v144_v27 }
  0x1c   :  { %182 = vmatpush.msrb.mxu1 %v146_v24  ;;  %536 = vmatpush.msra.mxu2 %v143_v28 }
  0x1d   :  { %507 = vmatmul.msk.f32.gmra.mxu0 %vm52_vm1, %v30_v26  ;;  %512 = vmatmul.msk.f32.gmra.mxu1 %vm52_vm1, %v30_v26  ;;  %v161_v26 = vld [vmem:[%s879_s4 + $0x18] sm:$0xff] }
  0x1e   :  { %183 = vmatpush.msrb.mxu1 %v145_v25  ;;  %537 = vmatpush.msra.mxu2 %v142_v29 }
  0x20   :  { %184 = vmatpush.msrb.mxu1 %v144_v27  ;;  %538 = vmatpush.msra.mxu2 %v141_v30 }
  0x22   :  { %185 = vmatpush.msrb.mxu1 %v143_v28  ;;  %539 = vmatpush.msra.mxu2 %v140_v32 }
  0x24   :  { %186 = vmatpush.msrb.mxu1 %v142_v29  ;;  %540 = vmatpush.msra.mxu2 %v139_v33 }
  0x25   :  { %508 = vmatmul.msk.f32.gmra.mxu0 %vm52_vm1, %v31_v31  ;;  %513 = vmatmul.msk.f32.gmra.mxu1 %vm52_vm1, %v31_v31  ;;  %vm397_vm1 = vcmask 335952  }
  0x26   :  { %187 = vmatpush.msrb.mxu1 %v141_v30  ;;  %541 = vmatpush.msra.mxu2 %v138_v34 }
  0x28   :  { %188 = vmatpush.msrb.mxu1 %v140_v32  ;;  %v550_v32 = vld [vmem:[%s878_s6] ss:$0 sm:$0xff] }
  0x2a   :  { %189 = vmatpush.msrb.mxu1 %v139_v33 }
  0x2c   :  { %190 = vmatpush.msrb.mxu1 %v138_v34 }
  0x8a   :  { %v89_v39 = vpop.f32.mrf.mxu0  ;;  %v118_v40 = vpop.f32.mrf.mxu1 }
  0x8b   :  { %v90_v41 = vadd.f32 %v89_v39, %v44_v37  ;;  %v119_v42 = vadd.f32 %v118_v40, %v45_v38 }
  0x8d   :  { %v130_v43 = vmax.f32 %v90_v41, 0.0  ;;  %v131_v44 = vmax.f32 %v119_v42, 0.0 }
  0x8f   :  { %191 = vmatmul.f32.vlgmr.msrb.gmra.mxu1 %v130_v43  ;;  %514 = vmatmul.msk.f32.vlgmr.msrb.gmra.mxu0 %vm162_vm2, %v131_v44 }
  0x92   :  { %v92_v47 = vpop.f32.mrf.mxu0  ;;  %v121_v48 = vpop.f32.mrf.mxu1 }
  0x93   :  { %v93_v49 = vadd.f32 %v92_v47, %v46_v45  ;;  %v122_v50 = vadd.f32 %v121_v48, %v47_v46 }
  0x95   :  { %v132_v51 = vmax.f32 %v93_v49, 0.0  ;;  %v133_v52 = vmax.f32 %v122_v50, 0.0 }
  0x97   :  { %194 = vmatmul.f32.vlgmr.msra.gmra.mxu2 %v132_v51  ;;  %515 = vmatmul.msk.f32.gmra.mxu0 %vm162_vm2, %v133_v52 }
  0x9a   :  { %v95_v55 = vpop.f32.mrf.mxu0  ;;  %v124_v56 = vpop.f32.mrf.mxu1 }
  0x9b   :  { %v96_v57 = vadd.f32 %v95_v55, %v48_v53  ;;  %v125_v58 = vadd.f32 %v124_v56, %v49_v54 }
  0x9d   :  { %v134_v59 = vmax.f32 %v96_v57, 0.0  ;;  %v135_v60 = vmax.f32 %v125_v58, 0.0 }
  0x9f   :  { %197 = vmatmul.f32.gmra.mxu2 %v134_v59  ;;  %516 = vmatmul.msk.f32.vlgmr.msra.gmra.mxu3 %vm162_vm2, %v135_v60 }
  0xa2   :  { %v98_v63 = vpop.f32.mrf.mxu0  ;;  %v127_v0 = vpop.f32.mrf.mxu1 }
  0xa3   :  { %v99_v1 = vadd.f32 %v98_v63, %v50_v61  ;;  %v128_v2 = vadd.f32 %v127_v0, %v51_v62  ;;  %v286_v61 = vlaneseq }
  0xa5   :  { %v136_v3 = vmax.f32 %v99_v1, 0.0  ;;  %v137_v4 = vmax.f32 %v128_v2, 0.0  ;;  %v823_v62 = vshrl.u32 %v286_v61, 7 }
  0xa7   :  { %200 = vmatmul.f32.gmra.mxu2 %v136_v3  ;;  %517 = vmatmul.msk.f32.gmra.mxu3 %vm162_vm2, %v137_v4  ;;  %v826_v63 = vadd.s32 8, %v823_v62 }
  0xa9   :  { %vm290_vm5 = vcmp.lt.s32.totalorder %v826_v63, 10 }
 0x10c   :  { %v192_v9 = vpop.f32.mrf.mxu1  ;;  %v221_v10 = vpop.f32.mrf.mxu0 }
 0x10d   :  { %v193_v11 = vadd.f32 %v192_v9, %v158_v8 }
 0x10f   :  { %v222_v12 = vadd.f32 %v221_v10, %v193_v11 }
 0x111   :  { %v233_v13 = vmax.f32 %v222_v12, 0.0 }
 0x113   :  { %518 = vmatmul.msk.f32.vlgmr.msrb.gmra.mxu3 %vm162_vm2, %v233_v13 }
 0x114   :  { %v224_v17 = vpop.f32.mrf.mxu0 }
 0x11a   :  { %v195_v15 = vpop.f32.mrf.mxu2 }
 0x11b   :  { %v196_v16 = vadd.f32 %v195_v15, %v159_v14 }
 0x11d   :  { %v225_v18 = vadd.f32 %v224_v17, %v196_v16 }
 0x11f   :  { %v234_v19 = vmax.f32 %v225_v18, 0.0 }
 0x121   :  { %519 = vmatmul.msk.f32.gmra.mxu3 %vm162_vm2, %v234_v19 }
 0x122   :  { %v198_v21 = vpop.f32.mrf.mxu2  ;;  %v227_v22 = vpop.f32.mrf.mxu3 }
 0x123   :  { %v199_v23 = vadd.f32 %v198_v21, %v160_v20 }
 0x125   :  { %v228_v24 = vadd.f32 %v227_v22, %v199_v23 }
 0x127   :  { %v235_v25 = vmax.f32 %v228_v24, 0.0 }
 0x129   :  { %520 = vmatmul.msk.f32.gmra.mxu3 %vm162_vm2, %v235_v25 }
 0x12a   :  { %v201_v27 = vpop.f32.mrf.mxu2  ;;  %v230_v28 = vpop.f32.mrf.mxu3 }
 0x12b   :  { %v202_v29 = vadd.f32 %v201_v27, %v161_v26 }
 0x12d   :  { %v231_v30 = vadd.f32 %v230_v28, %v202_v29 }
 0x12f   :  { %v236_v31 = vmax.f32 %v231_v30, 0.0 }
 0x131   :  { %521 = vmatmul.msk.f32.gmra.mxu3 %vm162_vm2, %v236_v31 }
 0x196   :  { %v274_v33 = vpop.f32.mrf.mxu3 }
 0x197   :  { %v787_v34 = vadd.f32 %v550_v32, %v274_v33 }
 0x199   :  { %388 = vst.msk [vmem:[%s880_s8] sm:$0xff] %vm162_vm2, %v787_v34  ;;  %303 = vrot.lane.b32.xlu1 %v787_v34, %s563_s15  ;;  %v299_v41 = vmul.f32 0.25, %v787_v34 }
 0x19b   :  { %v300_v42 = vperm.slane %v299_v41, 0 }
 0x1a4   :  { %v277_v35 = vpop.f32.mrf.mxu3 }
 0x1a5   :  { %v795_v36 = vadd.f32 %v550_v32, %v277_v35 }
 0x1a7   :  { %390 = vst.msk [vmem:[%s880_s8 + $0x8] sm:$0x3] %vm389_vm3, %v795_v36  ;;  %305 = vrot.lane.b32.xlu0 %v795_v36, %s563_s15 }
 0x1ac   :  { %v280_v37 = vpop.f32.mrf.mxu3 }
 0x1ad   :  { %v802_v38 = vadd.f32 %v550_v32, %v280_v37 }
 0x1af   :  { %524 = vst.msk [vmem:[%s880_s8 + $0x10] sm:$0xff] %vm162_vm2, %v802_v38  ;;  %403 = vrot.lane.b32.xlu1 %v802_v38, %s563_s15  ;;  %v399_v47 = vmul.f32 0.25, %v802_v38 }
 0x1b1   :  { %v400_v48 = vperm.slane %v399_v47, 0 }
 0x1b4   :  { %v283_v39 = vpop.f32.mrf.mxu3 }
 0x1b5   :  { %v810_v40 = vadd.f32 %v550_v32, %v283_v39 }
 0x1b7   :  { %525 = vst.msk [vmem:[%s880_s8 + $0x18] sm:$0x3] %vm389_vm3, %v810_v40  ;;  %405 = vrot.lane.b32.xlu0 %v810_v40, %s563_s15 }
 0x20b   :  { %v304_v43 = vpop.permute.xlu1 %303 }
 0x20c   :  { %v309_v44 = vmul.f32 %v304_v43, %v300_v42 }
 0x20e   :  { %313 = vrot.lane.b32.xlu0 %v309_v44, %s564_s20 }
 0x219   :  { %v306_v45 = vpop.permute.xlu0 %305 }
 0x21a   :  { %v310_v46 = vmul.f32 %v306_v45, %v300_v42  ;;  %v292_v45 = vand.u32 127, %v286_v61 }
 0x21c   :  { %315 = vrot.lane.b32.xlu2 %v310_v46, %s564_s20  ;;  %vm293_vm7 = vcmp.eq.s32.totalorder %v823_v62, %v292_v45  ;;  %vm294_vm9 = vcmp.eq.s32.totalorder %v826_v63, %v292_v45 }
 0x221   :  { %v404_v49 = vpop.permute.xlu1 %403 }
 0x222   :  { %v409_v50 = vmul.f32 %v404_v49, %v400_v48 }
 0x224   :  { %413 = vrot.lane.b32.xlu1 %v409_v50, %s564_s20 }
 0x229   :  { %v406_v51 = vpop.permute.xlu0 %405 }
 0x22a   :  { %v410_v52 = vmul.f32 %v406_v51, %v400_v48 }
 0x22c   :  { %415 = vrot.lane.b32.xlu2 %v410_v52, %s564_s20 }
 0x276   :  { %v316_v53 = vpop.permute.xlu2 %315 }
 0x277   :  { %v323_v54 = vsel %vm319_vm4, %v316_v53, 0.0 }
 0x278   :  { %324 = vadd.xlane.f32.xlu2 %v323_v54 }
 0x280   :  { %v314_v55 = vpop.permute.xlu0 %313 }
 0x281   :  { %v320_v56 = vsel %vm319_vm4, %v314_v55, 0.0 }
 0x282   :  { %321 = vadd.xlane.f32.xlu1 %v320_v56 }
 0x286   :  { %v416_v57 = vpop.permute.xlu2 %415 }
 0x287   :  { %v422_v58 = vsel %vm319_vm4, %v416_v57, 0.0  ;;  %v565_v57 = vmov 0.0  }
 0x288   :  { %423 = vadd.xlane.f32.xlu0 %v422_v58  ;;  %v522_v58 = vsel %vm293_vm7, 1.0, %v565_v57 }
 0x296   :  { %v414_v59 = vpop.permute.xlu1 %413 }
 0x297   :  { %v419_v60 = vsel %vm319_vm4, %v414_v59, 0.0 }
 0x298   :  { %420 = vadd.xlane.f32.xlu2 %v419_v60  ;;  %v523_v60 = vsel %vm294_vm9, 1.0, %v565_v57 }
 0x2eb   :  { %v325_v0 = vpop.xlane.xlu2 %324 }
 0x2ec   :  { %v327_v1 = vsel %vm290_vm5, %v325_v0, -1e+30 }
 0x2f5   :  { %v322_v2 = vpop.xlane.xlu1 %321 }
 0x2f6   :  { %v328_v3 = vmax.f32 %v322_v2, %v327_v1 }
 0x2f8   :  { %v329_v4 = vrot.slane %v328_v3, 4 }
 0x2fa   :  { %v330_v5 = vmax.f32 %v328_v3, %v329_v4 }
 0x2fb   :  { %v424_v14 = vpop.xlane.xlu0 %423 }
 0x2fc   :  { %v331_v6 = vrot.slane %v330_v5, 2  ;;  %v426_v15 = vsel %vm290_vm5, %v424_v14, -1e+30 }
 0x2fe   :  { %v332_v7 = vmax.f32 %v330_v5, %v331_v6 }
 0x300   :  { %v333_v8 = vrot.slane %v332_v7, 1 }
 0x302   :  { %v334_v9 = vmax.f32 %v332_v7, %v333_v8 }
 0x304   :  { %v335_v10 = vsub.f32 %v322_v2, %v334_v9  ;;  %v336_v11 = vsub.f32 %v327_v1, %v334_v9 }
 0x306   :  { %v337_v12 = vmul.f32 1.442695, %v335_v10  ;;  %v339_v13 = vmul.f32 1.442695, %v336_v11 }
 0x308   :  { %551 = vpow2.f32 %v337_v12 }
 0x309   :  { %553 = vpow2.f32 %v339_v13 }
 0x30b   :  { %v421_v16 = vpop.xlane.xlu2 %420 }
 0x30c   :  { %v427_v17 = vmax.f32 %v421_v16, %v426_v15 }
 0x30e   :  { %v552_v18 = vpop.eup %551  ;;  %v428_v19 = vrot.slane %v427_v17, 4 }
 0x30f   :  { %v554_v20 = vpop.eup %553 }
 0x310   :  { %v341_v21 = vadd.f32 %v554_v20, %v552_v18  ;;  %v429_v22 = vmax.f32 %v427_v17, %v428_v19 }
 0x312   :  { %v342_v23 = vrot.slane %v341_v21, 4  ;;  %v430_v24 = vrot.slane %v429_v22, 2 }
 0x314   :  { %v343_v25 = vadd.f32 %v342_v23, %v341_v21  ;;  %v431_v26 = vmax.f32 %v429_v22, %v430_v24 }
 0x316   :  { %v344_v27 = vrot.slane %v343_v25, 2  ;;  %v432_v28 = vrot.slane %v431_v26, 1 }
 0x318   :  { %v345_v29 = vadd.f32 %v344_v27, %v343_v25  ;;  %v433_v30 = vmax.f32 %v431_v26, %v432_v28 }
 0x31a   :  { %v346_v31 = vrot.slane %v345_v29, 1  ;;  %v434_v32 = vsub.f32 %v421_v16, %v433_v30  ;;  %v435_v33 = vsub.f32 %v426_v15, %v433_v30 }
 0x31c   :  { %v347_v35 = vadd.f32 %v346_v31, %v345_v29  ;;  %v436_v37 = vmul.f32 1.442695, %v434_v32  ;;  %v438_v39 = vmul.f32 1.442695, %v435_v33 }
 0x31e   :  { %555 = vrcp.f32 %v347_v35  ;;  %v359_v48 = vand.u32 2147483648, %v347_v35  ;;  %v357_v50 = vand.u32 2147483647, %v347_v35  ;;  %vm353_vm8 = vweird.f32 %v347_v35 }
 0x31f   :  { %557 = vpow2.f32 %v436_v37 }
 0x320   :  { %559 = vpow2.f32 %v438_v39  ;;  %v360_v54 = vor.u32 1.1754944e-38, %v359_v48  ;;  %vm358_vm11 = vcmp.eq.f32.partialorder %v357_v50, 8.507059e+37 }
 0x324   :  { %v556_v41 = vpop.eup %555 }
 0x325   :  { %v833_v42 = vpop.eup %557  ;;  %v349_v43 = vmul.f32 %v556_v41, %v347_v35  ;;  %vm354_vm6 = vweird.f32 %v556_v41 }
 0x326   :  { %v835_v44 = vpop.eup %559  ;;  %vm355_vm10 = vmor %vm353_vm8, %vm354_vm6 }
 0x327   :  { %v350_v46 = vsub.f32 1.0, %v349_v43  ;;  %v440_v47 = vadd.f32 %v835_v44, %v833_v42 }
 0x329   :  { %v351_v49 = vmul.f32 %v556_v41, %v350_v46  ;;  %v441_v51 = vrot.slane %v440_v47, 4 }
 0x32b   :  { %v352_v52 = vadd.f32 %v556_v41, %v351_v49  ;;  %v442_v53 = vadd.f32 %v441_v51, %v440_v47 }
 0x32d   :  { %v356_v55 = vsel %vm355_vm10, %v556_v41, %v352_v52  ;;  %v443_v56 = vrot.slane %v442_v53, 2 }
 0x32e   :  { %v361_v59 = vsel %vm358_vm11, %v360_v54, %v356_v55 }
 0x32f   :  { %v362_v61 = vmul.f32 %v552_v18, %v361_v59  ;;  %v363_v0 = vmul.f32 %v554_v20, %v361_v59  ;;  %v444_v1 = vadd.f32 %v443_v56, %v442_v53 }
 0x331   :  { %v365_v62 = vsel %vm290_vm5, %v363_v0, 0.0  ;;  %v366_v2 = vmul.f32 %v362_v61, %v787_v34  ;;  %v377_v3 = vmul.f32 %v522_v58, %v362_v61  ;;  %v445_v4 = vrot.slane %v444_v1, 1 }
 0x332   :  { %v378_v5 = vmul.f32 %v523_v60, %v365_v62  ;;  %v367_v6 = vmul.f32 %v365_v62, %v795_v36 }
 0x333   :  { %v379_v7 = vsel %vm319_vm4, %v377_v3, 0.0  ;;  %v446_v8 = vadd.f32 %v445_v4, %v444_v1  ;;  %v368_v9 = vsel %vm162_vm2, %v366_v2, 0.0 }
 0x334   :  { %v380_v10 = vsel %vm319_vm4, %v378_v5, 0.0  ;;  %v369_v11 = vsel %vm162_vm2, %v367_v6, 0.0 }
 0x335   :  { %v381_v12 = vadd.f32 %v380_v10, %v379_v7  ;;  %561 = vrcp.f32 %v446_v8  ;;  %v370_v13 = vadd.f32 %v369_v11, %v368_v9  ;;  %v458_v23 = vand.u32 2147483648, %v446_v8 }
 0x336   :  { %v456_v26 = vand.u32 2147483647, %v446_v8  ;;  %vm452_vm14 = vweird.f32 %v446_v8 }
 0x337   :  { %v382_v14 = vrot.slane %v381_v12, 4  ;;  %v371_v15 = vrot.slane %v370_v13, 4  ;;  %v459_v31 = vor.u32 1.1754944e-38, %v458_v23 }
 0x338   :  { %vm457_vm0 = vcmp.eq.f32.partialorder %v456_v26, 8.507059e+37 }
 0x339   :  { %v383_v34 = vadd.f32 %v382_v14, %v381_v12  ;;  %v372_v16 = vadd.f32 %v371_v15, %v370_v13 }
 0x33b   :  { %v562_v17 = vpop.eup %561  ;;  %v384_v18 = vrot.slane %v383_v34, 2  ;;  %v373_v36 = vrot.slane %v372_v16, 2 }
 0x33c   :  { %v448_v19 = vmul.f32 %v562_v17, %v446_v8  ;;  %vm453_vm13 = vweird.f32 %v562_v17 }
 0x33d   :  { %v385_v20 = vadd.f32 %v384_v18, %v383_v34  ;;  %v374_v22 = vadd.f32 %v373_v36, %v372_v16  ;;  %vm454_vm15 = vmor %vm452_vm14, %vm453_vm13 }
 0x33e   :  { %v449_v21 = vsub.f32 1.0, %v448_v19 }
 0x33f   :  { %v386_v24 = vrot.slane %v385_v20, 1  ;;  %v375_v27 = vrot.slane %v374_v22, 1 }
 0x340   :  { %v450_v25 = vmul.f32 %v562_v17, %v449_v21 }
 0x341   :  { %v387_v28 = vadd.f32 %v386_v24, %v385_v20  ;;  %v376_v30 = vadd.f32 %v375_v27, %v374_v22 }
 0x342   :  { %v451_v29 = vadd.f32 %v562_v17, %v450_v25 }
 0x343   :  { %392 = vst.msk [vmem:[%s881_s7] sm:$0x1] %vm391_vm12, %v387_v28  ;;  %394 = vrot.lane.b32.xlu2 %v376_v30, %s566_s22 }
 0x344   :  { %v455_v32 = vsel %vm454_vm15, %v562_v17, %v451_v29 }
 0x345   :  { %v460_v33 = vsel %vm457_vm0, %v459_v31, %v455_v32 }
 0x346   :  { %v461_v35 = vmul.f32 %v833_v42, %v460_v33  ;;  %v462_v37 = vmul.f32 %v835_v44, %v460_v33 }
 0x348   :  { %v464_v39 = vsel %vm290_vm5, %v462_v37, 0.0  ;;  %v465_v41 = vmul.f32 %v461_v35, %v802_v38  ;;  %v476_v43 = vmul.f32 %v522_v58, %v461_v35 }
 0x349   :  { %v477_v45 = vmul.f32 %v523_v60, %v464_v39  ;;  %v466_v46 = vmul.f32 %v464_v39, %v810_v40 }
 0x34a   :  { %v478_v47 = vsel %vm319_vm4, %v476_v43, 0.0  ;;  %v467_v48 = vsel %vm162_vm2, %v465_v41, 0.0 }
 0x34b   :  { %v479_v49 = vsel %vm319_vm4, %v477_v45, 0.0  ;;  %v468_v50 = vsel %vm162_vm2, %v466_v46, 0.0 }
 0x34c   :  { %v480_v42 = vadd.f32 %v479_v49, %v478_v47  ;;  %v469_v51 = vadd.f32 %v468_v50, %v467_v48 }
 0x34e   :  { %v481_v44 = vrot.slane %v480_v42, 4  ;;  %v470_v52 = vrot.slane %v469_v51, 4 }
 0x350   :  { %v471_v63 = vadd.f32 %v470_v52, %v469_v51  ;;  %v482_v53 = vadd.f32 %v481_v44, %v480_v42 }
 0x352   :  { %v472_v54 = vrot.slane %v471_v63, 2  ;;  %v483_v38 = vrot.slane %v482_v53, 2 }
 0x354   :  { %v473_v55 = vadd.f32 %v472_v54, %v471_v63  ;;  %v484_v56 = vadd.f32 %v483_v38, %v482_v53 }
 0x356   :  { %v474_v57 = vrot.slane %v473_v55, 1  ;;  %v485_v40 = vrot.slane %v484_v56, 1 }
 0x358   :  { %v475_v58 = vadd.f32 %v474_v57, %v473_v55  ;;  %v486_v59 = vadd.f32 %v485_v40, %v484_v56 }
 0x35a   :  { %492 = vrot.lane.b32.xlu0 %v475_v58, %s566_s22  ;;  %490 = vst.msk [vmem:[%s881_s7 + $0x1] sm:$0x1] %vm391_vm12, %v486_v59 }
 0x39d   :  { %v395_v60 = vpop.permute.xlu2 %394 }
 0x39e   :  { %398 = vst.msk [vmem:[%s881_s7] sm:$0x1] %vm397_vm1, %v395_v60 }
 0x3cc   :  { %v493_v61 = vpop.permute.xlu0 %492 }
 0x3cd   :  { %495 = vst.msk [vmem:[%s881_s7 + $0x1] sm:$0x1] %vm397_vm1, %v493_v61 }

</bundles_post_ra>
